<compile_context>
chip_gen: v6e
topology: v6e:2x2x1
jax: 0.10.0
libtpu: 0.0.40
codegen_flags: <defaults>
</compile_context>

<pallas_src>
import functools
import math

import jax
import jax.numpy as jnp
from jax.experimental import pallas as pl
from jax.experimental.pallas import tpu as pltpu


def _cia_partial_kernel(pred_ref, t_ref, out_ref, *,
                        thresh, rows, tr, rt_ps, need_mask):
    """Accumulate lane-wise per-image partial sums over row-tiles.

    pred_ref : (1, 2, tr, 128) block   (both channels of one row-tile)
    t_ref    : (1, tr, 128)    block
    out_ref  : (1, 1, 4, 128)  block, resident across the row-tile grid axis;
               rows 0..3 accumulate lane-wise partials of
               [st_sum, intersection, pred1_sum, tgt_sum].
    """
    s = pl.program_id(1)
    j = pl.program_id(2)

    p0 = pred_ref[0, 0].astype(jnp.float32)     # (tr, 128)
    p1 = pred_ref[0, 1].astype(jnp.float32)     # (tr, 128)
    tgt = t_ref[0].astype(jnp.float32)          # (tr, 128)

    if need_mask:
        # Ragged / fully-OOB tiles: zero the rows past the image extent.
        gidx = s * rt_ps + j
        valid = rows - gidx * tr                # may be <= 0 or > tr
        row_id = jax.lax.broadcasted_iota(jnp.int32, (tr, 1), 0)
        m = row_id < valid                      # (tr, 1) bool
        p1 = jnp.where(m, p1, 0.0)
        tgt = jnp.where(m, tgt, 0.0)

    # ----- _st_loss elementwise map (hot path, VALU-trimmed) -----
    # pt = (target > 0) * (pred0 + pred1)
    pt = jnp.where(tgt > 0, p0 + p1, 0.0)
    # uncertain branch: log(th) - (1 - (pt/th)^2)/2 == c0 + c1 * pt^2
    c0 = math.log(thresh) - 0.5
    c1 = 0.5 / (thresh * thresh)
    st = jnp.where(pt > thresh, jnp.log(pt + 1e-6), c0 + c1 * pt * pt)
    if need_mask:
        st = jnp.where(m, st, 0.0)

    # ----- lane-wise partial reductions (sublane-axis only) -----
    st_l = jnp.sum(st, axis=0, keepdims=True)         # (1, 128)
    in_l = jnp.sum(p1 * tgt, axis=0, keepdims=True)
    ps_l = jnp.sum(p1, axis=0, keepdims=True)
    ts_l = jnp.sum(tgt, axis=0, keepdims=True)
    part = jnp.concatenate([st_l, in_l, ps_l, ts_l], axis=0)   # (4, 128)

    @pl.when(j == 0)
    def _():
        out_ref[...] = jnp.zeros_like(out_ref)

    out_ref[0, 0] += part


def _vmem_capacity_bytes():
    try:
        return int(pltpu.get_tpu_info().vmem_capacity_bytes)
    except Exception:
        return 64 << 20   # conservative (v7x per-TensorCore)


def cia_loss(pred, target, thresh=0.5, lw=0.42, row_tile=None):
    """JAX/Pallas equivalent of CIA_LOSS.forward.

    pred   : (B, 2, H, W) float32 or bfloat16   (NCHW, 2 prediction channels)
    target : (B, H, W)    float32 or bfloat16
    returns scalar float32
    """
    B, C, H, W = pred.shape
    assert C == 2
    assert target.shape == (B, H, W)
    N = H * W

    # ----- lane-dense (rows, 128) presentation of the spatial dim -----
    pad = (-N) % 128
    rows = (N + pad) // 128
    pred_f = pred.reshape(B, 2, N)
    tgt_f = target.reshape(B, N)
    if pad:
        pred_f = jnp.pad(pred_f, ((0, 0), (0, 0), (0, pad)))
        tgt_f = jnp.pad(tgt_f, ((0, 0), (0, pad)))
    pred_r = pred_f.reshape(B, 2, rows, 128)
    tgt_r = tgt_f.reshape(B, rows, 128)

    p_item = jnp.dtype(pred.dtype).itemsize
    t_item = jnp.dtype(target.dtype).itemsize
    bytes_per_row = (2 * p_item + t_item) * 128

    # ----- generation-aware row-tile selection -----
    cap = _vmem_capacity_bytes()
    if row_tile is None:
        budget = int(cap * 0.35)                 # double-buffered input blocks
        tr = budget // (2 * bytes_per_row)
        tr = min(tr, 8192)
    else:
        tr = int(row_tile)
    if tr >= rows:
        tr = rows                                # full extent (always legal)
    else:
        tr = max(8, (tr // 8) * 8)               # (8,128) block constraint

    rt_total = -(-rows // tr)                    # cdiv

    # Megacore split of the reduction axis when the batch axis can't feed
    # both v7x TensorCores.
    nsplit = 2 if (B == 1 and rt_total >= 2) else 1
    rt_ps = -(-rt_total // nsplit)
    need_mask = (nsplit * rt_ps * tr != rows)
    need_clamp = (nsplit * rt_ps > rt_total)

    def _row_block(s, j):
        g = s * rt_ps + j
        if need_clamp:
            g = jnp.minimum(g, rt_total - 1)
        return g

    per_step_in_bytes = bytes_per_row * tr
    vmem_limit = min(cap, 2 * per_step_in_bytes + (8 << 20))
    vmem_limit = max(vmem_limit, 32 << 20)

    elems = B * rows * 128
    cost = pl.CostEstimate(
        flops=12 * elems,
        transcendentals=elems,
        bytes_accessed=(2 * p_item + t_item) * elems + B * nsplit * 4 * 128 * 4,
    )

    kernel = functools.partial(
        _cia_partial_kernel,
        thresh=float(thresh), rows=rows, tr=tr, rt_ps=rt_ps,
        need_mask=need_mask)

    partials = pl.pallas_call(
        kernel,
        out_shape=jax.ShapeDtypeStruct((B, nsplit, 4, 128), jnp.float32),
        grid=(B, nsplit, rt_ps),
        in_specs=[
            pl.BlockSpec((1, 2, tr, 128), lambda i, s, j: (i, 0, _row_block(s, j), 0)),
            pl.BlockSpec((1, tr, 128), lambda i, s, j: (i, _row_block(s, j), 0)),
        ],
        out_specs=pl.BlockSpec((1, 1, 4, 128), lambda i, s, j: (i, s, 0, 0)),
        compiler_params=pltpu.CompilerParams(
            dimension_semantics=("parallel", "parallel", "arbitrary"),
            vmem_limit_bytes=int(vmem_limit)),
        cost_estimate=cost,
    )(pred_r, tgt_r)

    # ----- tiny final reductions in plain jnp -----
    per_image = jnp.sum(partials, axis=(1, 3))   # (B, 4)
    st_sums = per_image[:, 0]
    inter = jnp.sum(per_image[:, 1])
    psum = jnp.sum(per_image[:, 2])
    tsum = jnp.sum(per_image[:, 3])

    # Exact correction for zero-padded spatial elements: each contributes
    # log(thresh) - 0.5 to the st sum and 0 to the dice sums.
    if pad:
        st_sums = st_sums - pad * (math.log(float(thresh)) - 0.5)

    # _st_loss: mirrors the torch code's hard-coded /512/512 scale.
    st_loss = -jnp.sum(st_sums) / 512.0 / 512.0 / B

    # dice_loss (standard soft Dice on foreground channel, smooth=1.0).
    smooth = 1.0
    dice = 1.0 - (2.0 * inter + smooth) / (psum + tsum + smooth)

    return lw * dice + st_loss


def _cia_loss_ref(pred, target, thresh=0.5, lw=0.42):
    """Pure-JAX reference mirroring the torch code (for sanity checking)."""
    B = pred.shape[0]
    predf = pred.astype(jnp.float32)
    tgtf = target.astype(jnp.float32)
    w = (tgtf > 0).astype(jnp.float32)
    pt = w * predf[:, 1] + w * predf[:, 0]
    certain = (pt > thresh).astype(jnp.float32)
    term = certain * jnp.log(pt + 1e-6) + (1.0 - certain) * (
        math.log(thresh) - (1.0 - (pt / thresh) ** 2) / 2.0)
    iand = -jnp.sum(term.reshape(B, -1), axis=1)
    st = jnp.sum(iand / 512.0 / 512.0) / B

    smooth = 1.0
    p1 = predf[:, 1]
    inter = jnp.sum(p1 * tgtf)
    dice = 1.0 - (2.0 * inter + smooth) / (jnp.sum(p1) + jnp.sum(tgtf) + smooth)
    return lw * dice + st


def _check(key, B, H, W, row_tile=None):
    k1, k2 = jax.random.split(key)
    pred = jax.random.uniform(k1, (B, 2, H, W), dtype=jnp.float32,
                              minval=0.05, maxval=0.95)
    target = (jax.random.uniform(k2, (B, H, W), dtype=jnp.float32) > 0.5
              ).astype(jnp.float32)
    loss = jax.block_until_ready(cia_loss(pred, target, thresh=0.5, lw=0.42,
                                          row_tile=row_tile))
    ref = jax.block_until_ready(_cia_loss_ref(pred, target, thresh=0.5, lw=0.42))
    assert jnp.isfinite(loss), "loss is not finite"
    assert abs(float(loss) - float(ref)) < 2e-4, (B, H, W, float(loss), float(ref))
    return loss


if __name__ == "__main__":
    root = jax.random.PRNGKey(0)
    k_a, k_b, k_c = jax.random.split(root, 3)

    # Main small example (B=2, spatial 16): simple divisible path.
    _check(k_a, B=2, H=16, W=16)
    # Non-128-divisible spatial size: exercises the zero-pad + correction path.
    _check(k_b, B=2, H=24, W=24)
    # B==1 with a forced small row tile: exercises the megacore split,
    # cdiv grid, clamped index_map and ragged-tile masking.
    _check(k_c, B=1, H=64, W=72, row_tile=8)

    print("KERNEL_OK")
</pallas_src>

<mosaic_0001>
module attributes {stable_mosaic.version = 11 : i64} {
  func.func @_cia_partial_kernel(%arg0: i32, %arg1: i32, %arg2: i32, %arg3: memref<1x2x2x128xf32, #tpu.memory_space<vmem>>, %arg4: memref<1x2x128xf32, #tpu.memory_space<vmem>>, %arg5: memref<1x1x4x128xf32, #tpu.memory_space<vmem>>) attributes {dimension_semantics = [#tpu.dimension_semantics<parallel>, #tpu.dimension_semantics<parallel>, #tpu.dimension_semantics<arbitrary>], iteration_bounds = array<i64: 2, 1, 1>, scalar_prefetch = 0 : i64, scratch_operands = 0 : i64, tpu.core_type = #tpu.core_type<tc>, window_params = [{transform_indices = @transform_0, window_bounds = array<i64: 1, 2, 2, 128>}, {transform_indices = @transform_1, window_bounds = array<i64: 1, 2, 128>}, {transform_indices = @transform_2, window_bounds = array<i64: 1, 1, 4, 128>}]} {
    %c0 = arith.constant 0 : index
    %c0_0 = arith.constant 0 : index
    %c0_1 = arith.constant 0 : index
    %c0_2 = arith.constant 0 : index
    %0 = vector.load %arg3[%c0, %c0_0, %c0_1, %c0_2] : memref<1x2x2x128xf32, #tpu.memory_space<vmem>>, vector<1x1x2x128xf32>
    %1 = vector.shape_cast %0 : vector<1x1x2x128xf32> to vector<2x128xf32>
    %c0_3 = arith.constant 0 : index
    %c1 = arith.constant 1 : index
    %c0_4 = arith.constant 0 : index
    %c0_5 = arith.constant 0 : index
    %2 = vector.load %arg3[%c0_3, %c1, %c0_4, %c0_5] : memref<1x2x2x128xf32, #tpu.memory_space<vmem>>, vector<1x1x2x128xf32>
    %3 = vector.shape_cast %2 : vector<1x1x2x128xf32> to vector<2x128xf32>
    %c0_6 = arith.constant 0 : index
    %c0_7 = arith.constant 0 : index
    %c0_8 = arith.constant 0 : index
    %4 = vector.load %arg4[%c0_6, %c0_7, %c0_8] : memref<1x2x128xf32, #tpu.memory_space<vmem>>, vector<1x2x128xf32>
    %5 = vector.shape_cast %4 : vector<1x2x128xf32> to vector<2x128xf32>
    %cst = arith.constant 0.000000e+00 : f32
    %6 = vector.broadcast %cst : f32 to vector<2x128xf32>
    %7 = arith.cmpf ogt, %5, %6 : vector<2x128xf32>
    %8 = arith.addf %1, %3 : vector<2x128xf32>
    %cst_9 = arith.constant 0.000000e+00 : f32
    %9 = vector.broadcast %cst_9 : f32 to vector<2x128xf32>
    %10 = arith.select %7, %8, %9 : vector<2x128xi1>, vector<2x128xf32>
    %cst_10 = arith.constant 5.000000e-01 : f32
    %11 = vector.broadcast %cst_10 : f32 to vector<2x128xf32>
    %12 = arith.cmpf ogt, %10, %11 : vector<2x128xf32>
    %cst_11 = arith.constant 9.99999997E-7 : f32
    %13 = vector.broadcast %cst_11 : f32 to vector<2x128xf32>
    %14 = arith.addf %10, %13 : vector<2x128xf32>
    %15 = math.log %14 : vector<2x128xf32>
    %cst_12 = arith.constant 2.000000e+00 : f32
    %16 = vector.broadcast %cst_12 : f32 to vector<2x128xf32>
    %17 = arith.mulf %16, %10 : vector<2x128xf32>
    %18 = arith.mulf %17, %10 : vector<2x128xf32>
    %cst_13 = arith.constant -1.19314718 : f32
    %19 = vector.broadcast %cst_13 : f32 to vector<2x128xf32>
    %20 = arith.addf %19, %18 : vector<2x128xf32>
    %21 = arith.select %12, %15, %20 : vector<2x128xi1>, vector<2x128xf32>
    %cst_14 = arith.constant dense<0.000000e+00> : vector<128xf32>
    %22 = vector.multi_reduction <add>, %21, %cst_14 [0] : vector<2x128xf32> to vector<128xf32>
    %23 = vector.shape_cast %22 : vector<128xf32> to vector<1x128xf32>
    %24 = arith.mulf %3, %5 : vector<2x128xf32>
    %cst_15 = arith.constant dense<0.000000e+00> : vector<128xf32>
    %25 = vector.multi_reduction <add>, %24, %cst_15 [0] : vector<2x128xf32> to vector<128xf32>
    %26 = vector.shape_cast %25 : vector<128xf32> to vector<1x128xf32>
    %cst_16 = arith.constant dense<0.000000e+00> : vector<128xf32>
    %27 = vector.multi_reduction <add>, %3, %cst_16 [0] : vector<2x128xf32> to vector<128xf32>
    %28 = vector.shape_cast %27 : vector<128xf32> to vector<1x128xf32>
    %cst_17 = arith.constant dense<0.000000e+00> : vector<128xf32>
    %29 = vector.multi_reduction <add>, %5, %cst_17 [0] : vector<2x128xf32> to vector<128xf32>
    %30 = vector.shape_cast %29 : vector<128xf32> to vector<1x128xf32>
    %31 = tpu.concatenate %23, %26, %28, %30 in 0 : vector<1x128xf32>, vector<1x128xf32>, vector<1x128xf32>, vector<1x128xf32> -> vector<4x128xf32>
    %c0_i32 = arith.constant 0 : i32
    %32 = arith.cmpi eq, %arg2, %c0_i32 : i32
    %33 = arith.extui %32 : i1 to i32
    %c0_i32_18 = arith.constant 0 : i32
    %34 = arith.cmpi ne, %33, %c0_i32_18 : i32
    scf.if %34 {
      %cst_27 = arith.constant 0.000000e+00 : f32
      %41 = vector.broadcast %cst_27 : f32 to vector<1x1x4x128xf32>
      %c0_28 = arith.constant 0 : index
      %c0_29 = arith.constant 0 : index
      %c0_30 = arith.constant 0 : index
      %c0_31 = arith.constant 0 : index
      %42 = vector.load %arg5[%c0_28, %c0_29, %c0_30, %c0_31] : memref<1x1x4x128xf32, #tpu.memory_space<vmem>>, vector<1x1x4x128xf32>
      tpu.vector_store %arg5[%c0_28, %c0_29, %c0_30, %c0_31], %41 {strides = array<i32>} : memref<1x1x4x128xf32, #tpu.memory_space<vmem>>, vector<1x1x4x128xf32>,
    } else {
    }
    %c0_19 = arith.constant 0 : index
    %c0_20 = arith.constant 0 : index
    %c0_21 = arith.constant 0 : index
    %c0_22 = arith.constant 0 : index
    %35 = vector.load %arg5[%c0_19, %c0_20, %c0_21, %c0_22] : memref<1x1x4x128xf32, #tpu.memory_space<vmem>>, vector<1x1x4x128xf32>
    %36 = vector.shape_cast %35 : vector<1x1x4x128xf32> to vector<4x128xf32>
    %37 = arith.addf %36, %31 : vector<4x128xf32>
    %c0_23 = arith.constant 0 : index
    %c0_24 = arith.constant 0 : index
    %c0_25 = arith.constant 0 : index
    %c0_26 = arith.constant 0 : index
    %38 = vector.load %arg5[%c0_23, %c0_24, %c0_25, %c0_26] : memref<1x1x4x128xf32, #tpu.memory_space<vmem>>, vector<1x1x4x128xf32>
    %39 = vector.shape_cast %38 : vector<1x1x4x128xf32> to vector<4x128xf32>
    %40 = vector.shape_cast %37 : vector<4x128xf32> to vector<1x1x4x128xf32>
    tpu.vector_store %arg5[%c0_23, %c0_24, %c0_25, %c0_26], %40 {strides = array<i32>} : memref<1x1x4x128xf32, #tpu.memory_space<vmem>>, vector<1x1x4x128xf32>,
    return
  }
  func.func @transform_0(%arg0: i32, %arg1: i32, %arg2: i32) -> (i32, i32, i32, i32) {
    %c1_i32 = arith.constant 1 : i32
    %0 = arith.muli %arg1, %c1_i32 : i32
    %1 = arith.addi %0, %arg2 : i32
    %c0_i32 = arith.constant 0 : i32
    %c0_i32_0 = arith.constant 0 : i32
    %c0_i32_1 = arith.constant 0 : i32
    return %arg0, %c0_i32, %1, %c0_i32_0 : i32, i32, i32, i32
  }
  func.func @transform_1(%arg0: i32, %arg1: i32, %arg2: i32) -> (i32, i32, i32) {
    %c1_i32 = arith.constant 1 : i32
    %0 = arith.muli %arg1, %c1_i32 : i32
    %1 = arith.addi %0, %arg2 : i32
    %c0_i32 = arith.constant 0 : i32
    %c0_i32_0 = arith.constant 0 : i32
    return %arg0, %1, %c0_i32 : i32, i32, i32
  }
  func.func @transform_2(%arg0: i32, %arg1: i32, %arg2: i32) -> (i32, i32, i32, i32) {
    %c0_i32 = arith.constant 0 : i32
    %c0_i32_0 = arith.constant 0 : i32
    %c0_i32_1 = arith.constant 0 : i32
    return %arg0, %arg1, %c0_i32, %c0_i32_0 : i32, i32, i32, i32
  }
}

</mosaic_0001>

<bundles_post_ra>
// kernel: tpu_custom_call.1
= control target key start
LH: loop header
LB: loop body
LE: loop exit
PB: predicated region body
PF: predicated region fallthrough
CT: control target
= control target key end

     0   :  { %7 = vsyncpa [#allocation3], 0  ;;  %s844_s0 = inlined_call_operand.hbm [shape: f32[2,2,2,128], index: 0, kind: input, shape index: {}]   ;;  %s845_s1 = inlined_call_operand.hbm [shape: f32[2,2,128], index: 1, kind: input, shape index: {}]   ;;  %s846_s2 = inlined_call_operand.hbm [shape: f32[2,1,4,128], index: 2, kind: output, shape index: {}]  }
   0x1   :  { %9 = vsyncpa [#allocation3 + $0x1], 0 }
   0x2   :  { %10 = vsyncpa [#allocation6], 0 }
   0x3   :  { %12 = vsyncpa [#allocation6 + $0x1], 0 }
   0x4   :  { %13 = vsyncpa [#allocation4], 0 }
   0x5   :  { %15 = vsyncpa [#allocation4 + $0x1], 0  ;;  %s671_s9 = smov 0   ;;  %s673_s10 = smov 0  }
   0x6   :  { %s675_s11 = smov 0   ;;  %s677_s12 = smov 0  }
   0x7   :  { %s679_s13 = smov 0   ;;  %s681_s14 = smov 0  }
   0x8 LB: > { %s417_s15 = sadd.s32 4294967295, %s648_s14   ;;  %s418_s16 = sadd.s32 4294967294, %s648_s14   ;;  %s648_s14 = sphi %s681_s14, %s21_s14   ;;  %s644_s13 = sphi %s679_s13, %s858_s13   ;;  %s640_s12 = sphi %s677_s12, %s857_s12   ;;  %s636_s11 = sphi %s675_s11, %s856_s11   ;;  %s632_s10 = sphi %s673_s10, %s855_s10   ;;  %s628_s9 = sphi %s671_s9, %s854_s9  }
   0x9   : > { %s40_s17 = sadd.s32 1, %s644_s13  ;;  %s51_s18 = sadd.s32 1, %s636_s11 }
   0xa   : > { %p42_p0 = scmp.ge.s32.totalorder %s40_s17, 2  ;;  %p58_p1 = scmp.ne.s32.totalorder %s636_s11, %s632_s10 }
   0xb   : > { %p59_p2 = scmp.eq.s32.totalorder %s648_s14, 0  ;;  %p64_p3 = scmp.ne.s32.totalorder %s632_s10, %s628_s9 }
   0xc   : > { %s860_s17 = smov (%p42_p0, %s40_s17), 0  ;;  %p65_p5 = scmp.eq.s32.totalorder %s417_s15, 0 }
   0xd   : > { %p712_p4 = por %p59_p2, %p58_p1  ;;  %s46_s20 = ssub.s32 %s644_s13, %s860_s17 }
   0xe   : > { %p120_p6 = scmp.eq.s32.totalorder %s417_s15, 1  ;;  %p49_p7 = scmp.eq.s32.totalorder %s46_s20, 0 }
   0xf   : > { %p718_p8 = por %p65_p5, %p64_p3  ;;  %p126_p10 = scmp.eq.s32.totalorder %s418_s16, 1 }
  0x10   : > { %p722_p9 = por %p120_p6, %p58_p1  ;;  %p453_p13 = scmp.lt.s32.totalorder %s648_s14, 2 }
  0x11   : > { %s727_s23 = scalar_select %p49_p7, %s636_s11, %s51_s18  }
  0x12   : > { %p729_p11 = por %p126_p10, %p64_p3  ;;  %s736_s25 = sand.u32 1, %s636_s11  }
  0x13   : > { %s421_s26 = sshll.u32 %s736_s25, 2  ;;  %s435_s27 = sshll.u32 %s644_s13, 6 }
  0x14   : > { %s158_s30 = scalar_lea.hbm %s844_s0, %s435_s27  ;;  %s150_s3 = scalar_lea.vmem [#allocation2], %s421_s26 }
  0x15   : > { %s159_s4 = sshll.u32 %s150_s3, 4  ;;  %p745_p0 = pnand %p453_p13, %p712_p4  ;;  %s160_s4 = int_to_ptr.vmem [resolvable:$true] %s159_s4 }
  0x16   : > { %p426_p1 = scmp.ge.s32.totalorder %s648_s14, 1  ;;  %s147_s6 = scalar_lea.sflag [#allocation3], %s736_s25 }
  0x17   : > { %p510_p2 = pneg %p745_p0  ;;  %s521_s7 = scalar_lea.vmem %s160_s4, 64 }
  0x18   : > { %p522_p3 = scmp.ne.s32.totalorder %s160_s4, %s521_s7  ;;  %s650_s8 = smov [#allocation2]  }
  0x19   : > { %s526_s15 = sshll.u32 %s650_s8, 4  ;;  %s527_s15 = int_to_ptr.vmem [resolvable:$false] %s526_s15 }
  0x1a   : > { %p524_p5 = pnand %p522_p3, %p510_p2  ;;  %s528_s16 = scalar_lea.vmem %s527_s15, 128 }
  0x1b   : > { %p529_p4 = scmp.lt.s32.totalorder %s160_s4, %s527_s15  ;;  %p530_p7 = scmp.lt.s32.totalorder %s528_s16, %s521_s7 }
  0x1c   : > { %p525_p6 = pneg %p524_p5 }
  0x1d   : > { %p531_p10 = por %p530_p7, %p529_p4 }
  0x1f   : > { %p532_p13 = pnand %p531_p10, %p525_p6 }
  0x21   : > { %535 = shalt.err (!%p532_p13)
}
  0x22   : > { %s651_s18 = smov 32   ;;  %s652_s19 = smov 2  }
  0x23   : > { %445 = dma.hbm_to_vmem [thread:$0]  (!%p745_p0), %s158_s30, 64, %s160_s4, %s147_s6, %s651_s18, %s651_s18, %s652_s19  }
  0x24   : > { %p187_p3 = scmp.lt.s32.totalorder %s648_s14, 3  ;;  %s424_s20 = sshll.u32 %s736_s25, 1 }
  0x25   : > { %s425_s26 = sshll.u32 %s644_s13, 5  ;;  %s173_s7 = scalar_lea.vmem [#allocation5], %s424_s20 }
  0x26   : > { %p763_p5 = pnand %p426_p1, %p187_p3  ;;  %s180_s3 = scalar_lea.hbm %s845_s1, %s425_s26 }
  0x27   : > { %s182_s8 = sshll.u32 %s173_s7, 4  ;;  %s170_s15 = scalar_lea.sflag [#allocation6], %s736_s25  ;;  %s183_s8 = int_to_ptr.vmem [resolvable:$true] %s182_s8 }
  0x28   : > { %s549_s16 = scalar_lea.vmem %s183_s8, 32  ;;  %s653_s30 = smov [#allocation5]  }
  0x29   : > { %p550_p6 = scmp.ne.s32.totalorder %s183_s8, %s549_s16  ;;  %s554_s4 = sshll.u32 %s653_s30, 4  ;;  %s555_s4 = int_to_ptr.vmem [resolvable:$false] %s554_s4 }
  0x2a   : > { %s556_s6 = scalar_lea.vmem %s555_s4, 64  ;;  %p557_p1 = scmp.lt.s32.totalorder %s183_s8, %s555_s4 }
  0x2b   : > { %p552_p4 = pnand %p550_p6, %p510_p2  ;;  %p558_p10 = scmp.lt.s32.totalorder %s556_s6, %s549_s16 }
  0x2d   : > { %p553_p7 = pneg %p552_p4  ;;  %p559_p13 = por %p558_p10, %p557_p1 }
  0x2f   : > { %p560_p3 = pnand %p559_p13, %p553_p7 }
  0x31   : > { %563 = shalt.err (!%p560_p3)
}
  0x32   : > { %448 = dma.hbm_to_vmem [thread:$0]  (!%p745_p0), %s180_s3, 32, %s183_s8, %s170_s15  }
  0x33   : > { %191 = sbr.rel (%p763_p5) target bundleno = 115 (0x73), region = 28  ;;  %s779_s25 = sand.u32 (!%p763_p5), 1, %s632_s10  }
  0x34   : > { %s427_s18 = sshll.u32 (!%p763_p5), %s779_s25, 2  ;;  %s194_s19 = scalar_lea.sflag (!%p763_p5), [#allocation3], %s779_s25 }
  0x35   : > { %s197_s20 = scalar_lea.vmem (!%p763_p5), [#allocation2], %s427_s18 }
  0x38   : > { %615 = dma.done.wait (%p718_p8), %s194_s19, 64  }
  0x39   : > { %617 = vsyncadd (%p718_p8), %s194_s19, 4294967232  ;;  %s428_s5 = sshll.u32 %s779_s25, 1  ;;  %s203_s26 = scalar_lea.sflag [#allocation6], %s779_s25 }
  0x3a   : > { %s206_s27 = scalar_lea.vmem [#allocation5], %s428_s5 }
  0x3b   : > { %619 = dma.done.wait (%p718_p8), %s203_s26, 32  }
  0x3c   : > { %621 = vsyncadd (%p718_p8), %s203_s26, 4294967264  ;;  %s793_s28 = scalar_lea.vmem [#allocation7], %s427_s18  ;;  %v654_v0 = vmov 0.0   ;;  %v234_v1 = vld [vmem:[%s197_s20] sm:$0x3]  ;;  %vm249_vm1 = vcmask 1041408  }
  0x3d   : > { %288 = vst [vmem:[%s793_s28] sm:$0xf] %v654_v0  ;;  %v430_v2 = vld [vmem:[%s197_s20 + $0x2] sm:$0x3]  ;;  %v237_v3 = vld [vmem:[%s206_s27] sm:$0x3]  ;;  %vm279_vm3 = vcmask 1040384  }
  0x3e   : > { %vm238_vm0 = vcmp.gt.f32.partialorder %v237_v3, 0.0  ;;  %v239_v4 = vadd.f32 %v430_v2, %v234_v1  ;;  %v257_v7 = vmul.f32 %v430_v2, %v237_v3  ;;  %v265_v10 = vsel %vm249_vm1, %v430_v2, 0.0  ;;  %s432_s21 = sshll.u32 %s640_s12, 6  ;;  %s307_s29 = sshll.u32 %s793_s28, 4  ;;  %s308_s29 = int_to_ptr.vmem [resolvable:$true] %s307_s29 }
  0x3f   : > { %v272_v11 = vsel %vm249_vm1, %v237_v3, 0.0  ;;  %v266_v13 = vrot.slane %v265_v10, 4  ;;  %vm282_vm4 = vcmask 1042432   ;;  %s305_s8 = scalar_lea.hbm %s846_s2, %s432_s21  ;;  %s293_s15 = scalar_lea.sflag [#allocation4], %s779_s25 }
  0x40   : > { %v240_v5 = vsel %vm238_vm0, %v239_v4, 0.0  ;;  %v258_v8 = vsel %vm249_vm1, %v257_v7, 0.0  ;;  %v273_v15 = vrot.slane %v272_v11, 4  ;;  %s564_s16 = scalar_lea.vmem %s308_s29, 64  ;;  %s655_s30 = smov [#allocation7]  }
  0x41   : > { %v242_v6 = vadd.f32 1e-06, %v240_v5  ;;  %v245_v9 = vmul.f32 2.0, %v240_v5  ;;  %v259_v12 = vrot.slane %v258_v8, 4  ;;  %v267_v17 = vadd.f32 %v266_v13, %v265_v10  ;;  %p565_p8 = scmp.ne.s32.totalorder %s308_s29, %s564_s16  ;;  %s568_s4 = sshll.u32 %s655_s30, 4  ;;  %s569_s4 = int_to_ptr.vmem [resolvable:$false] %s568_s4 }
  0x42   : > { %v274_v19 = vadd.f32 %v273_v15, %v272_v11  ;;  %vm241_vm2 = vcmp.gt.f32.partialorder %v240_v5, 0.5  ;;  %s570_s12 = scalar_lea.vmem %s569_s4, 128  ;;  %p571_p5 = scmp.lt.s32.totalorder %s308_s29, %s569_s4 }
  0x43   : > { %506 = vlog2.f32 %v242_v6  ;;  %v246_v14 = vmul.f32 %v245_v9, %v240_v5  ;;  %v260_v16 = vadd.f32 %v259_v12, %v258_v8  ;;  %v268_v23 = vrot.slane %v267_v17, 2  ;;  %p566_p0 = pnand %p565_p8, %p722_p9  ;;  %p572_p6 = scmp.lt.s32.totalorder %s570_s12, %s564_s16 }
  0x44   : > { %v275_v25 = vrot.slane %v274_v19, 2  ;;  %v289_v43 = vld [vmem:[%s793_s28] sm:$0xf] }
  0x45   : > { %v247_v18 = vadd.f32 -1.1931472, %v246_v14  ;;  %v261_v22 = vrot.slane %v260_v16, 2  ;;  %v269_v29 = vadd.f32 %v268_v23, %v267_v17  ;;  %p567_p2 = pneg %p566_p0  ;;  %p573_p4 = por %p572_p6, %p571_p5 }
  0x46   : > { %v276_v31 = vadd.f32 %v275_v25, %v274_v19 }
  0x47   : > { %v262_v28 = vadd.f32 %v261_v22, %v260_v16  ;;  %v270_v34 = vrot.slane %v269_v29, 1  ;;  %p574_p7 = pnand %p573_p4, %p567_p2 }
  0x48   : > { %v277_v36 = vrot.slane %v276_v31, 1 }
  0x49   : > { %v263_v33 = vrot.slane %v262_v28, 1  ;;  %v271_v39 = vadd.f32 %v270_v34, %v269_v29 }
  0x4a   : > { %v278_v41 = vadd.f32 %v277_v36, %v276_v31 }
  0x4b   : > { %v264_v38 = vadd.f32 %v263_v33, %v262_v28 }
  0x50   : > { %v507_v20 = vpop.eup %506 }
  0x51   : > { %v244_v21 = vmul.f32 0.6931472, %v507_v20 }
  0x53   : > { %v248_v24 = vsel %vm241_vm2, %v244_v21, %v247_v18 }
  0x54   : > { %v250_v26 = vsel %vm249_vm1, %v248_v24, 0.0 }
  0x55   : > { %v251_v27 = vrot.slane %v250_v26, 4 }
  0x57   : > { %v252_v30 = vadd.f32 %v251_v27, %v250_v26 }
  0x59   : > { %v253_v32 = vrot.slane %v252_v30, 2 }
  0x5b   : > { %v254_v35 = vadd.f32 %v253_v32, %v252_v30 }
  0x5d   : > { %v255_v37 = vrot.slane %v254_v35, 1 }
  0x5f   : > { %v256_v40 = vadd.f32 %v255_v37, %v254_v35 }
  0x61   : > { %v280_v42 = vsel %vm279_vm3, %v256_v40, %v264_v38 }
  0x62   : > { %v281_v44 = vsel %vm249_vm1, %v280_v42, %v271_v39 }
  0x63   : > { %v283_v45 = vsel %vm282_vm4, %v281_v44, %v278_v41 }
  0x64   : > { %v290_v46 = vadd.f32 %v289_v43, %v283_v45 }
  0x66   : > { %291 = vst [vmem:[%s793_s28] sm:$0xf] %v290_v46 }
  0x67   : > { %577 = shalt.err (!%p574_p7)
}
  0x68   : > { %s578_s6 = scalar_lea.hbm %s305_s8, 64  ;;  %s582_s19 = scalar_lea.hbm %s846_s2, 128 }
  0x69   : > { %p579_p1 = scmp.ne.s32.totalorder %s305_s8, %s578_s6  ;;  %p583_p3 = scmp.lt.s32.totalorder %s305_s8, %s846_s2 }
  0x6a   : > { %p584_p8 = scmp.lt.s32.totalorder %s582_s19, %s578_s6 }
  0x6b   : > { %p580_p10 = pnand %p579_p1, %p722_p9 }
  0x6c   : > { %p585_p0 = por %p584_p8, %p583_p3 }
  0x6d   : > { %p581_p13 = pneg %p580_p10 }
  0x6f   : > { %p586_p12 = pnand %p585_p0, %p581_p13 }
  0x71   : > { %589 = shalt.err (!%p586_p12)
}
  0x72   : > { %440 = dma.vmem_to_hbm [thread:$0]  (%p722_p9), %s308_s29, 64, %s305_s8, %s293_s15  }
  0x73 PF: > { %s319_s26 = sand.u32 1, %s628_s9   ;;  %p853_p2 = scmp.ge.s32.totalorder %s648_s14, 2 }
  0x74   : > { %s320_s27 = scalar_lea.sflag [#allocation4], %s319_s26 }
  0x75   : > { %p450_p5 = pnand %p853_p2, %p729_p11 }
  0x77   : > { %p451_p6 = pneg %p450_p5 }
  0x79   : > { %623 = dma.done.wait (%p451_p6), %s320_s27, 64  }
  0x7a   : > { %625 = vsyncadd (%p451_p6), %s320_s27, 4294967232  ;;  %s21_s14 = sadd.s32 1, %s648_s14   ;;  %s854_s9 = smov %s632_s10 }
  0x7b   : > { %p18_p4 = scmp.ge.s32.totalorder %s21_s14, 4   ;;  %s855_s10 = smov %s636_s11 }
  0x7c   : > { %s856_s11 = smov %s727_s23  ;;  %s857_s12 = smov %s644_s13 }
  0x7d   : > { %s858_s13 = smov %s860_s17  ;;  %20 = sbr.rel (!%p18_p4) target bundleno = 8 (0x8), region = 91 }
  0x82   :  { %325 = vsyncpa [#allocation3], 1 }
  0x83   :  { %327 = vsyncpa [#allocation3 + $0x1], 1 }
  0x84   :  { %328 = vsyncpa [#allocation6], 1 }
  0x85   :  { %330 = vsyncpa [#allocation6 + $0x1], 1 }
  0x86   :  { %331 = vsyncpa [#allocation4], 1 }
  0x87   :  { %333 = vsyncpa [#allocation4 + $0x1], 1 }

</bundles_post_ra>
